<compile_context>
chip_gen: v7x
topology: tpu7x:2x2x1
jax: 0.10.0
libtpu: 0.0.40
codegen_flags: <defaults>
</compile_context>

<pallas_src>
import jax
import jax.numpy as jnp
from jax.experimental import pallas as pl
from jax.experimental.pallas import tpu as pltpu


# Sublane-tile-aligned offset at which the live rows start inside the padded
# scratch buffers: all scratch WRITES are tile-aligned; the shifted conv taps
# are realized as (cheap, well-supported) offset READS.
_PAD = 8


def fused_fraud_cnn_kernel(
    x_ref,            # (TB, L, 1)      input window, channels-last
    w1_ref,           # (3, 1, 32)      conv1 taps (Cin == 1)
    s1_ref, t1_ref,   # (1, 32)         folded BN1 scale / shift (+ conv bias)
    w2_ref,           # (96, 64)        conv2 im2col weight (3*Cin, Cout)
    s2_ref, t2_ref,   # (1, 64)         folded BN2 scale / shift
    fw1_ref,          # (L4, 64, 128)   fc1 weight, flatten-permutation baked in
    fb1_ref,          # (1, 128)
    fw2_ref,          # (128, 64)
    fb2_ref,          # (1, 64)
    w3_ref,           # (1, 64)         fc3 weight as a row vector (N == 1)
    b3_ref,           # (1, 1)
    o_ref,            # (TB, 1)         sigmoid output
    xp_ref,           # (TB, L + 16, 1)      VMEM scratch: padded conv1 input
    h1p_ref,          # (TB, L//2 + 16, 32)  VMEM scratch: padded conv2 input
):
    TB, L, _ = x_ref.shape
    L2, L4 = L // 2, L // 4
    C1 = s1_ref.shape[1]          # 32
    C2 = s2_ref.shape[1]          # 64

    # ---------------- conv1 (Cin=1) + BN + ReLU + MaxPool -----------------
    # Cin == 1 => the conv is a rank-1 update; keep it on the VPU as broadcast
    # multiply-accumulates instead of wasting MXU pushes on K=1 matmuls.
    x = x_ref[...]                                                  # (TB, L, 1)
    xp_ref[...] = jnp.zeros(xp_ref.shape, jnp.float32)              # zero pad rows
    xp_ref[:, _PAD:_PAD + L, :] = x                                 # aligned write
    acc1 = x * w1_ref[1]                                            # x[l]   * w[1]
    acc1 = acc1 + xp_ref[:, _PAD - 1:_PAD - 1 + L, :] * w1_ref[0]   # x[l-1] * w[0]
    acc1 = acc1 + xp_ref[:, _PAD + 1:_PAD + 1 + L, :] * w1_ref[2]   # x[l+1] * w[2]
    y1 = jnp.maximum(acc1 * s1_ref[...] + t1_ref[...], 0.0)         # folded BN + ReLU
    p1 = jnp.max(y1.reshape(TB, L2, 2, C1), axis=2)                 # MaxPool1d(2, 2)

    # ---------------- conv2 + BN + ReLU + MaxPool --------------------------
    # im2col: one K = 3*Cin = 96 MXU matmul instead of three K=32 matmuls.
    h1p_ref[...] = jnp.zeros(h1p_ref.shape, jnp.float32)
    h1p_ref[:, _PAD:_PAD + L2, :] = p1
    cols = jnp.concatenate(
        [h1p_ref[:, _PAD - 1:_PAD - 1 + L2, :],                     # x2[l-1]
         p1,                                                        # x2[l]
         h1p_ref[:, _PAD + 1:_PAD + 1 + L2, :]],                    # x2[l+1]
        axis=-1)                                                    # (TB, L2, 96)
    acc2 = jnp.dot(cols.reshape(TB * L2, 3 * C1), w2_ref[...],
                   preferred_element_type=jnp.float32)              # (TB*L2, 64)
    y2 = jnp.maximum(acc2.reshape(TB, L2, C2) * s2_ref[...] + t2_ref[...], 0.0)
    p2 = jnp.max(y2.reshape(TB, L4, 2, C2), axis=2)                 # (TB, L4, 64)

    # ---------------- FC head ----------------------------------------------
    # fc1: fw1 is packed (L4, 64, 128) so the channels-last activation feeds it
    # directly -- the PyTorch channel-major flatten permutation was baked into
    # the weight at pack time (no runtime transpose).
    h = jnp.zeros((TB, fb1_ref.shape[1]), jnp.float32)
    for l in range(L4):                                             # static unroll
        h = h + jnp.dot(p2[:, l, :], fw1_ref[l],
                        preferred_element_type=jnp.float32)
    h = jnp.maximum(h + fb1_ref[...], 0.0)        # ReLU; Dropout(0.5) = id (eval)
    h = jnp.maximum(
        jnp.dot(h, fw2_ref[...], preferred_element_type=jnp.float32)
        + fb2_ref[...], 0.0)                      # ReLU; Dropout(0.3) = id (eval)
    # fc3 has N=1: multiply + cross-lane reduce (VPU/XLU) instead of an MXU dot.
    z = jnp.sum(h * w3_ref[...], axis=-1, keepdims=True) + b3_ref[...]
    o_ref[...] = jax.nn.sigmoid(z)


def _pick_batch_tile(B):
    # Keep the out-block's last-two dims TPU-friendly (tile covers the whole
    # batch, or is a multiple of 8 sublanes).  Prefer >=2 grid steps when
    # possible so v7x's two TensorCores both get work.
    if B % 8 != 0:
        return B
    for tb in (64, 32, 16, 8):
        if B % tb == 0 and B // tb >= 2:
            return tb
    return B


def fraud_cnn_forward(x, p):
    # x: (B, input_dim, 1) float32 -- same layout as the PyTorch module input
    # (the module's permute(0,2,1) just makes it NCL; channels-last here).
    B, L, cin = x.shape
    assert cin == 1 and L % 4 == 0, "FraudCNN needs Cin=1 and input_dim % 4 == 0"
    L2, L4 = L // 2, L // 4
    TB = _pick_batch_tile(B)
    n_steps = B // TB

    c2 = lambda b: (0, 0)
    c3 = lambda b: (0, 0, 0)
    return pl.pallas_call(
        fused_fraud_cnn_kernel,
        out_shape=jax.ShapeDtypeStruct((B, 1), jnp.float32),
        grid=(n_steps,),
        in_specs=[
            pl.BlockSpec((TB, L, 1), lambda b: (b, 0, 0)),     # x
            pl.BlockSpec((3, 1, 32), c3),                      # conv1 taps
            pl.BlockSpec((1, 32), c2), pl.BlockSpec((1, 32), c2),
            pl.BlockSpec((96, 64), c2),                        # conv2 im2col weight
            pl.BlockSpec((1, 64), c2), pl.BlockSpec((1, 64), c2),
            pl.BlockSpec((L4, 64, 128), c3),                   # fc1 weight
            pl.BlockSpec((1, 128), c2),                        # fc1 bias
            pl.BlockSpec((128, 64), c2),                       # fc2 weight
            pl.BlockSpec((1, 64), c2),                         # fc2 bias
            pl.BlockSpec((1, 64), c2),                         # fc3 weight row
            pl.BlockSpec((1, 1), c2),                          # fc3 bias
        ],
        out_specs=pl.BlockSpec((TB, 1), lambda b: (b, 0)),
        scratch_shapes=[
            pltpu.VMEM((TB, L + 2 * _PAD, 1), jnp.float32),    # padded conv1 input
            pltpu.VMEM((TB, L2 + 2 * _PAD, 32), jnp.float32),  # padded conv2 input
        ],
        compiler_params=pltpu.CompilerParams(
            dimension_semantics=("parallel",),
            vmem_limit_bytes=48 * 1024 * 1024,
        ),
    )(x, p["w1"], p["s1"], p["t1"], p["w2"], p["s2"], p["t2"],
      p["fw1"], p["fb1"], p["fw2"], p["fb2"], p["w3"], p["b3"])


# --------------------------------------------------------------------------
# Parameter setup (deterministic, synthetic) + packing
# --------------------------------------------------------------------------
def init_raw_params(key, input_dim):
    ks = jax.random.split(key, 20)

    def n(k, shape, scale=0.1):
        return scale * jax.random.normal(k, shape, dtype=jnp.float32)

    raw = {}
    # conv1: PyTorch Conv1d weight (Cout=32, Cin=1, K=3) + BN1 stats
    raw["cw1"] = n(ks[0], (32, 1, 3));  raw["cb1"] = n(ks[1], (32,))
    raw["g1"]  = 1.0 + n(ks[2], (32,)); raw["be1"] = n(ks[3], (32,))
    raw["m1"]  = n(ks[4], (32,))
    raw["v1"]  = 1.0 + 0.5 * jax.random.uniform(ks[5], (32,), dtype=jnp.float32)
    # conv2: (64, 32, 3) + BN2 stats
    raw["cw2"] = n(ks[6], (64, 32, 3)); raw["cb2"] = n(ks[7], (64,))
    raw["g2"]  = 1.0 + n(ks[8], (64,)); raw["be2"] = n(ks[9], (64,))
    raw["m2"]  = n(ks[10], (64,))
    raw["v2"]  = 1.0 + 0.5 * jax.random.uniform(ks[11], (64,), dtype=jnp.float32)
    # fc: Linear(F,128), Linear(128,64), Linear(64,1) with PyTorch (out,in) weights
    F = input_dim // 4 * 64
    raw["fw1"] = n(ks[12], (128, F)); raw["fb1"] = n(ks[13], (128,))
    raw["fw2"] = n(ks[14], (64, 128)); raw["fb2"] = n(ks[15], (64,))
    raw["fw3"] = n(ks[16], (1, 64));  raw["fb3"] = n(ks[17], (1,))
    return raw


def fold_bn(conv_bias, gamma, beta, mean, var, eps=1e-5):
    s = gamma / jnp.sqrt(var + eps)
    t = beta - mean * s
    return s.reshape(1, -1), (conv_bias * s + t).reshape(1, -1)


def pack_kernel_params(raw, input_dim):
    L4 = input_dim // 4
    p = {}
    # conv1 taps: (Cout,1,K) -> (K, 1, Cout) for the VPU broadcast MAC
    p["w1"] = jnp.transpose(raw["cw1"], (2, 1, 0))                  # (3, 1, 32)
    p["s1"], p["t1"] = fold_bn(raw["cb1"], raw["g1"], raw["be1"],
                               raw["m1"], raw["v1"])
    # conv2 im2col weight: rows ordered [tap0 x cin..., tap1 x cin..., tap2 x cin...]
    p["w2"] = jnp.transpose(raw["cw2"], (2, 1, 0)).reshape(3 * 32, 64)
    p["s2"], p["t2"] = fold_bn(raw["cb2"], raw["g2"], raw["be2"],
                               raw["m2"], raw["v2"])
    # fc1: PyTorch flatten on NCL indexes features f = c*L4 + l; re-pack so the
    # kernel's channels-last (l, c) activation hits the right rows directly.
    p["fw1"] = raw["fw1"].T.reshape(64, L4, 128).transpose(1, 0, 2)  # (L4, 64, 128)
    p["fb1"] = raw["fb1"].reshape(1, -1)
    p["fw2"] = raw["fw2"].T                                          # (128, 64)
    p["fb2"] = raw["fb2"].reshape(1, -1)
    p["w3"]  = raw["fw3"]                                            # (1, 64)
    p["b3"]  = raw["fb3"].reshape(1, 1)
    return p


# --------------------------------------------------------------------------
# Pure-JAX reference (mirrors the PyTorch forward in eval mode)
# --------------------------------------------------------------------------
def reference_forward(x, raw):
    h = jnp.transpose(x, (0, 2, 1))                   # (B, 1, L)  NCL

    def block(h, cw, cb, g, be, m, v):
        y = jax.lax.conv_general_dilated(
            h, cw, window_strides=(1,), padding=((1, 1),),
            dimension_numbers=("NCH", "OIH", "NCH"))
        y = y + cb[None, :, None]
        y = (y - m[None, :, None]) / jnp.sqrt(v[None, :, None] + 1e-5)
        y = y * g[None, :, None] + be[None, :, None]
        y = jnp.maximum(y, 0.0)
        Bc, C, L = y.shape
        return jnp.max(y.reshape(Bc, C, L // 2, 2), axis=-1)

    h = block(h, raw["cw1"], raw["cb1"], raw["g1"], raw["be1"], raw["m1"], raw["v1"])
    h = block(h, raw["cw2"], raw["cb2"], raw["g2"], raw["be2"], raw["m2"], raw["v2"])
    h = h.reshape(h.shape[0], -1)
    h = jnp.maximum(h @ raw["fw1"].T + raw["fb1"], 0.0)
    h = jnp.maximum(h @ raw["fw2"].T + raw["fb2"], 0.0)
    return jax.nn.sigmoid(h @ raw["fw3"].T + raw["fb3"])


if __name__ == "__main__":
    B, input_dim = 2, 16                              # input x: (2, 16, 1)
    key = jax.random.PRNGKey(0)
    k_x, k_p = jax.random.split(key)
    x = jax.random.normal(k_x, (B, input_dim, 1), dtype=jnp.float32)

    raw = init_raw_params(k_p, input_dim)
    params = pack_kernel_params(raw, input_dim)

    fwd = jax.jit(fraud_cnn_forward)
    out = jax.block_until_ready(fwd(x, params))

    ref = jax.block_until_ready(reference_forward(x, raw))
    assert out.shape == (B, 1), out.shape
    assert jnp.allclose(out, ref, atol=1e-5, rtol=1e-5), (out, ref)
    print("KERNEL_OK")
</pallas_src>

<mosaic_0001>
module attributes {stable_mosaic.version = 11 : i64} {
  func.func @fused_fraud_cnn_kernel(%arg0: i32, %arg1: memref<2x16x1xf32, #tpu.memory_space<vmem>>, %arg2: memref<3x1x32xf32, #tpu.memory_space<vmem>>, %arg3: memref<1x32xf32, #tpu.memory_space<vmem>>, %arg4: memref<1x32xf32, #tpu.memory_space<vmem>>, %arg5: memref<96x64xf32, #tpu.memory_space<vmem>>, %arg6: memref<1x64xf32, #tpu.memory_space<vmem>>, %arg7: memref<1x64xf32, #tpu.memory_space<vmem>>, %arg8: memref<4x64x128xf32, #tpu.memory_space<vmem>>, %arg9: memref<1x128xf32, #tpu.memory_space<vmem>>, %arg10: memref<128x64xf32, #tpu.memory_space<vmem>>, %arg11: memref<1x64xf32, #tpu.memory_space<vmem>>, %arg12: memref<1x64xf32, #tpu.memory_space<vmem>>, %arg13: memref<1x1xf32, #tpu.memory_space<vmem>>, %arg14: memref<2x1xf32, #tpu.memory_space<vmem>>, %arg15: memref<2x32x1xf32, #tpu.memory_space<vmem>>, %arg16: memref<2x24x32xf32, #tpu.memory_space<vmem>>) attributes {dimension_semantics = [#tpu.dimension_semantics<parallel>], iteration_bounds = array<i64: 1>, scalar_prefetch = 0 : i64, scratch_operands = 2 : i64, tpu.core_type = #tpu.core_type<tc>, window_params = [{transform_indices = @transform_0, window_bounds = array<i64: 2, 16, 1>}, {pipeline_mode = #tpu.pipeline_mode<synchronous>, transform_indices = @transform_1, window_bounds = array<i64: 3, 1, 32>}, {pipeline_mode = #tpu.pipeline_mode<synchronous>, transform_indices = @transform_2, window_bounds = array<i64: 1, 32>}, {pipeline_mode = #tpu.pipeline_mode<synchronous>, transform_indices = @transform_3, window_bounds = array<i64: 1, 32>}, {pipeline_mode = #tpu.pipeline_mode<synchronous>, transform_indices = @transform_4, window_bounds = array<i64: 96, 64>}, {pipeline_mode = #tpu.pipeline_mode<synchronous>, transform_indices = @transform_5, window_bounds = array<i64: 1, 64>}, {pipeline_mode = #tpu.pipeline_mode<synchronous>, transform_indices = @transform_6, window_bounds = array<i64: 1, 64>}, {pipeline_mode = #tpu.pipeline_mode<synchronous>, transform_indices = @transform_7, window_bounds = array<i64: 4, 64, 128>}, {pipeline_mode = #tpu.pipeline_mode<synchronous>, transform_indices = @transform_8, window_bounds = array<i64: 1, 128>}, {pipeline_mode = #tpu.pipeline_mode<synchronous>, transform_indices = @transform_9, window_bounds = array<i64: 128, 64>}, {pipeline_mode = #tpu.pipeline_mode<synchronous>, transform_indices = @transform_10, window_bounds = array<i64: 1, 64>}, {pipeline_mode = #tpu.pipeline_mode<synchronous>, transform_indices = @transform_11, window_bounds = array<i64: 1, 64>}, {pipeline_mode = #tpu.pipeline_mode<synchronous>, transform_indices = @transform_12, window_bounds = array<i64: 1, 1>}, {transform_indices = @transform_13, window_bounds = array<i64: 2, 1>}]} {
    %c0 = arith.constant 0 : index
    %c0_0 = arith.constant 0 : index
    %c0_1 = arith.constant 0 : index
    %0 = vector.load %arg1[%c0, %c0_0, %c0_1] : memref<2x16x1xf32, #tpu.memory_space<vmem>>, vector<2x16x1xf32>
    %cst = arith.constant 0.000000e+00 : f32
    %1 = vector.broadcast %cst : f32 to vector<2x32x1xf32>
    %c0_2 = arith.constant 0 : index
    %c0_3 = arith.constant 0 : index
    %c0_4 = arith.constant 0 : index
    %2 = vector.load %arg15[%c0_2, %c0_3, %c0_4] : memref<2x32x1xf32, #tpu.memory_space<vmem>>, vector<2x32x1xf32>
    tpu.vector_store %arg15[%c0_2, %c0_3, %c0_4], %1 {strides = array<i32>} : memref<2x32x1xf32, #tpu.memory_space<vmem>>, vector<2x32x1xf32>,
    %c0_5 = arith.constant 0 : index
    %c8 = arith.constant 8 : index
    %c0_6 = arith.constant 0 : index
    %3 = vector.load %arg15[%c0_5, %c8, %c0_6] : memref<2x32x1xf32, #tpu.memory_space<vmem>>, vector<2x16x1xf32>
    tpu.vector_store %arg15[%c0_5, %c8, %c0_6], %0 {strides = array<i32>} : memref<2x32x1xf32, #tpu.memory_space<vmem>>, vector<2x16x1xf32>,
    %c1 = arith.constant 1 : index
    %c0_7 = arith.constant 0 : index
    %c0_8 = arith.constant 0 : index
    %4 = vector.load %arg2[%c1, %c0_7, %c0_8] : memref<3x1x32xf32, #tpu.memory_space<vmem>>, vector<1x1x32xf32>
    %5 = vector.shape_cast %4 : vector<1x1x32xf32> to vector<1x32xf32>
    %6 = vector.shape_cast %5 : vector<1x32xf32> to vector<1x1x32xf32>
    %7 = vector.broadcast %0 : vector<2x16x1xf32> to vector<2x16x32xf32>
    %8 = vector.broadcast %6 : vector<1x1x32xf32> to vector<2x16x32xf32>
    %9 = arith.mulf %7, %8 : vector<2x16x32xf32>
    %c0_9 = arith.constant 0 : index
    %c7 = arith.constant 7 : index
    %c0_10 = arith.constant 0 : index
    %10 = vector.load %arg15[%c0_9, %c7, %c0_10] : memref<2x32x1xf32, #tpu.memory_space<vmem>>, vector<2x16x1xf32>
    %c0_11 = arith.constant 0 : index
    %c0_12 = arith.constant 0 : index
    %c0_13 = arith.constant 0 : index
    %11 = vector.load %arg2[%c0_11, %c0_12, %c0_13] : memref<3x1x32xf32, #tpu.memory_space<vmem>>, vector<1x1x32xf32>
    %12 = vector.shape_cast %11 : vector<1x1x32xf32> to vector<1x32xf32>
    %13 = vector.shape_cast %12 : vector<1x32xf32> to vector<1x1x32xf32>
    %14 = vector.broadcast %10 : vector<2x16x1xf32> to vector<2x16x32xf32>
    %15 = vector.broadcast %13 : vector<1x1x32xf32> to vector<2x16x32xf32>
    %16 = arith.mulf %14, %15 : vector<2x16x32xf32>
    %17 = arith.addf %9, %16 : vector<2x16x32xf32>
    %c0_14 = arith.constant 0 : index
    %c9 = arith.constant 9 : index
    %c0_15 = arith.constant 0 : index
    %18 = vector.load %arg15[%c0_14, %c9, %c0_15] : memref<2x32x1xf32, #tpu.memory_space<vmem>>, vector<2x16x1xf32>
    %c2 = arith.constant 2 : index
    %c0_16 = arith.constant 0 : index
    %c0_17 = arith.constant 0 : index
    %19 = vector.load %arg2[%c2, %c0_16, %c0_17] : memref<3x1x32xf32, #tpu.memory_space<vmem>>, vector<1x1x32xf32>
    %20 = vector.shape_cast %19 : vector<1x1x32xf32> to vector<1x32xf32>
    %21 = vector.shape_cast %20 : vector<1x32xf32> to vector<1x1x32xf32>
    %22 = vector.broadcast %18 : vector<2x16x1xf32> to vector<2x16x32xf32>
    %23 = vector.broadcast %21 : vector<1x1x32xf32> to vector<2x16x32xf32>
    %24 = arith.mulf %22, %23 : vector<2x16x32xf32>
    %25 = arith.addf %17, %24 : vector<2x16x32xf32>
    %c0_18 = arith.constant 0 : index
    %c0_19 = arith.constant 0 : index
    %26 = vector.load %arg3[%c0_18, %c0_19] : memref<1x32xf32, #tpu.memory_space<vmem>>, vector<1x32xf32>
    %27 = vector.shape_cast %26 : vector<1x32xf32> to vector<1x1x32xf32>
    %28 = vector.broadcast %27 : vector<1x1x32xf32> to vector<2x16x32xf32>
    %29 = arith.mulf %25, %28 : vector<2x16x32xf32>
    %c0_20 = arith.constant 0 : index
    %c0_21 = arith.constant 0 : index
    %30 = vector.load %arg4[%c0_20, %c0_21] : memref<1x32xf32, #tpu.memory_space<vmem>>, vector<1x32xf32>
    %31 = vector.shape_cast %30 : vector<1x32xf32> to vector<1x1x32xf32>
    %32 = vector.broadcast %31 : vector<1x1x32xf32> to vector<2x16x32xf32>
    %33 = arith.addf %29, %32 : vector<2x16x32xf32>
    %cst_22 = arith.constant 0.000000e+00 : f32
    %34 = vector.broadcast %cst_22 : f32 to vector<2x16x32xf32>
    %35 = arith.maximumf %33, %34 : vector<2x16x32xf32>
    %36 = vector.shape_cast %35 : vector<2x16x32xf32> to vector<2x8x2x32xf32>
    %cst_23 = arith.constant dense<0xFF800000> : vector<2x8x32xf32>
    %37 = vector.multi_reduction <maximumf>, %36, %cst_23 [2] : vector<2x8x2x32xf32> to vector<2x8x32xf32>
    %cst_24 = arith.constant 0.000000e+00 : f32
    %38 = vector.broadcast %cst_24 : f32 to vector<2x24x32xf32>
    %c0_25 = arith.constant 0 : index
    %c0_26 = arith.constant 0 : index
    %c0_27 = arith.constant 0 : index
    %39 = vector.load %arg16[%c0_25, %c0_26, %c0_27] : memref<2x24x32xf32, #tpu.memory_space<vmem>>, vector<2x24x32xf32>
    tpu.vector_store %arg16[%c0_25, %c0_26, %c0_27], %38 {strides = array<i32>} : memref<2x24x32xf32, #tpu.memory_space<vmem>>, vector<2x24x32xf32>,
    %c0_28 = arith.constant 0 : index
    %c8_29 = arith.constant 8 : index
    %c0_30 = arith.constant 0 : index
    %40 = vector.load %arg16[%c0_28, %c8_29, %c0_30] : memref<2x24x32xf32, #tpu.memory_space<vmem>>, vector<2x8x32xf32>
    tpu.vector_store %arg16[%c0_28, %c8_29, %c0_30], %37 {strides = array<i32>} : memref<2x24x32xf32, #tpu.memory_space<vmem>>, vector<2x8x32xf32>,
    %c0_31 = arith.constant 0 : index
    %c7_32 = arith.constant 7 : index
    %c0_33 = arith.constant 0 : index
    %41 = vector.load %arg16[%c0_31, %c7_32, %c0_33] : memref<2x24x32xf32, #tpu.memory_space<vmem>>, vector<2x8x32xf32>
    %c0_34 = arith.constant 0 : index
    %c9_35 = arith.constant 9 : index
    %c0_36 = arith.constant 0 : index
    %42 = vector.load %arg16[%c0_34, %c9_35, %c0_36] : memref<2x24x32xf32, #tpu.memory_space<vmem>>, vector<2x8x32xf32>
    %43 = tpu.concatenate %41, %37, %42 in 2 : vector<2x8x32xf32>, vector<2x8x32xf32>, vector<2x8x32xf32> -> vector<2x8x96xf32>
    %44 = vector.shape_cast %43 : vector<2x8x96xf32> to vector<16x96xf32>
    %c0_37 = arith.constant 0 : index
    %c0_38 = arith.constant 0 : index
    %45 = vector.load %arg5[%c0_37, %c0_38] : memref<96x64xf32, #tpu.memory_space<vmem>>, vector<96x64xf32>
    %cst_39 = arith.constant dense<0.000000e+00> : vector<16x64xf32>
    %46 = tpu.matmul %44, %45, %cst_39 {dimension_numbers = #tpu.dot_dimension_numbers<[1], [0], [0], [1], [0, 0, 1, 1], [], []>} : vector<16x96xf32>, vector<96x64xf32>, vector<16x64xf32> -> vector<16x64xf32>
    %47 = vector.shape_cast %46 : vector<16x64xf32> to vector<2x8x64xf32>
    %c0_40 = arith.constant 0 : index
    %c0_41 = arith.constant 0 : index
    %48 = vector.load %arg6[%c0_40, %c0_41] : memref<1x64xf32, #tpu.memory_space<vmem>>, vector<1x64xf32>
    %49 = vector.shape_cast %48 : vector<1x64xf32> to vector<1x1x64xf32>
    %50 = vector.broadcast %49 : vector<1x1x64xf32> to vector<2x8x64xf32>
    %51 = arith.mulf %47, %50 : vector<2x8x64xf32>
    %c0_42 = arith.constant 0 : index
    %c0_43 = arith.constant 0 : index
    %52 = vector.load %arg7[%c0_42, %c0_43] : memref<1x64xf32, #tpu.memory_space<vmem>>, vector<1x64xf32>
    %53 = vector.shape_cast %52 : vector<1x64xf32> to vector<1x1x64xf32>
    %54 = vector.broadcast %53 : vector<1x1x64xf32> to vector<2x8x64xf32>
    %55 = arith.addf %51, %54 : vector<2x8x64xf32>
    %cst_44 = arith.constant 0.000000e+00 : f32
    %56 = vector.broadcast %cst_44 : f32 to vector<2x8x64xf32>
    %57 = arith.maximumf %55, %56 : vector<2x8x64xf32>
    %58 = vector.shape_cast %57 : vector<2x8x64xf32> to vector<2x4x2x64xf32>
    %cst_45 = arith.constant dense<0xFF800000> : vector<2x4x64xf32>
    %59 = vector.multi_reduction <maximumf>, %58, %cst_45 [2] : vector<2x4x2x64xf32> to vector<2x4x64xf32>
    %cst_46 = arith.constant 0.000000e+00 : f32
    %60 = vector.broadcast %cst_46 : f32 to vector<2x128xf32>
    %61 = vector.extract_strided_slice %59 {offsets = [0, 0, 0], sizes = [2, 1, 64], strides = [1, 1, 1]} : vector<2x4x64xf32> to vector<2x1x64xf32>
    %62 = vector.shape_cast %61 : vector<2x1x64xf32> to vector<2x64xf32>
    %c0_47 = arith.constant 0 : index
    %c0_48 = arith.constant 0 : index
    %c0_49 = arith.constant 0 : index
    %63 = vector.load %arg8[%c0_47, %c0_48, %c0_49] : memref<4x64x128xf32, #tpu.memory_space<vmem>>, vector<1x64x128xf32>
    %64 = vector.shape_cast %63 : vector<1x64x128xf32> to vector<64x128xf32>
    %cst_50 = arith.constant dense<0.000000e+00> : vector<2x128xf32>
    %65 = tpu.matmul %62, %64, %cst_50 {dimension_numbers = #tpu.dot_dimension_numbers<[1], [0], [0], [1], [0, 0, 1, 1], [], []>} : vector<2x64xf32>, vector<64x128xf32>, vector<2x128xf32> -> vector<2x128xf32>
    %66 = arith.addf %60, %65 : vector<2x128xf32>
    %67 = vector.extract_strided_slice %59 {offsets = [0, 1, 0], sizes = [2, 1, 64], strides = [1, 1, 1]} : vector<2x4x64xf32> to vector<2x1x64xf32>
    %68 = vector.shape_cast %67 : vector<2x1x64xf32> to vector<2x64xf32>
    %c1_51 = arith.constant 1 : index
    %c0_52 = arith.constant 0 : index
    %c0_53 = arith.constant 0 : index
    %69 = vector.load %arg8[%c1_51, %c0_52, %c0_53] : memref<4x64x128xf32, #tpu.memory_space<vmem>>, vector<1x64x128xf32>
    %70 = vector.shape_cast %69 : vector<1x64x128xf32> to vector<64x128xf32>
    %cst_54 = arith.constant dense<0.000000e+00> : vector<2x128xf32>
    %71 = tpu.matmul %68, %70, %cst_54 {dimension_numbers = #tpu.dot_dimension_numbers<[1], [0], [0], [1], [0, 0, 1, 1], [], []>} : vector<2x64xf32>, vector<64x128xf32>, vector<2x128xf32> -> vector<2x128xf32>
    %72 = arith.addf %66, %71 : vector<2x128xf32>
    %73 = vector.extract_strided_slice %59 {offsets = [0, 2, 0], sizes = [2, 1, 64], strides = [1, 1, 1]} : vector<2x4x64xf32> to vector<2x1x64xf32>
    %74 = vector.shape_cast %73 : vector<2x1x64xf32> to vector<2x64xf32>
    %c2_55 = arith.constant 2 : index
    %c0_56 = arith.constant 0 : index
    %c0_57 = arith.constant 0 : index
    %75 = vector.load %arg8[%c2_55, %c0_56, %c0_57] : memref<4x64x128xf32, #tpu.memory_space<vmem>>, vector<1x64x128xf32>
    %76 = vector.shape_cast %75 : vector<1x64x128xf32> to vector<64x128xf32>
    %cst_58 = arith.constant dense<0.000000e+00> : vector<2x128xf32>
    %77 = tpu.matmul %74, %76, %cst_58 {dimension_numbers = #tpu.dot_dimension_numbers<[1], [0], [0], [1], [0, 0, 1, 1], [], []>} : vector<2x64xf32>, vector<64x128xf32>, vector<2x128xf32> -> vector<2x128xf32>
    %78 = arith.addf %72, %77 : vector<2x128xf32>
    %79 = vector.extract_strided_slice %59 {offsets = [0, 3, 0], sizes = [2, 1, 64], strides = [1, 1, 1]} : vector<2x4x64xf32> to vector<2x1x64xf32>
    %80 = vector.shape_cast %79 : vector<2x1x64xf32> to vector<2x64xf32>
    %c3 = arith.constant 3 : index
    %c0_59 = arith.constant 0 : index
    %c0_60 = arith.constant 0 : index
    %81 = vector.load %arg8[%c3, %c0_59, %c0_60] : memref<4x64x128xf32, #tpu.memory_space<vmem>>, vector<1x64x128xf32>
    %82 = vector.shape_cast %81 : vector<1x64x128xf32> to vector<64x128xf32>
    %cst_61 = arith.constant dense<0.000000e+00> : vector<2x128xf32>
    %83 = tpu.matmul %80, %82, %cst_61 {dimension_numbers = #tpu.dot_dimension_numbers<[1], [0], [0], [1], [0, 0, 1, 1], [], []>} : vector<2x64xf32>, vector<64x128xf32>, vector<2x128xf32> -> vector<2x128xf32>
    %84 = arith.addf %78, %83 : vector<2x128xf32>
    %c0_62 = arith.constant 0 : index
    %c0_63 = arith.constant 0 : index
    %85 = vector.load %arg9[%c0_62, %c0_63] : memref<1x128xf32, #tpu.memory_space<vmem>>, vector<1x128xf32>
    %86 = vector.broadcast %85 : vector<1x128xf32> to vector<2x128xf32>
    %87 = arith.addf %84, %86 : vector<2x128xf32>
    %cst_64 = arith.constant 0.000000e+00 : f32
    %88 = vector.broadcast %cst_64 : f32 to vector<2x128xf32>
    %89 = arith.maximumf %87, %88 : vector<2x128xf32>
    %c0_65 = arith.constant 0 : index
    %c0_66 = arith.constant 0 : index
    %90 = vector.load %arg10[%c0_65, %c0_66] : memref<128x64xf32, #tpu.memory_space<vmem>>, vector<128x64xf32>
    %cst_67 = arith.constant dense<0.000000e+00> : vector<2x64xf32>
    %91 = tpu.matmul %89, %90, %cst_67 {dimension_numbers = #tpu.dot_dimension_numbers<[1], [0], [0], [1], [0, 0, 1, 1], [], []>} : vector<2x128xf32>, vector<128x64xf32>, vector<2x64xf32> -> vector<2x64xf32>
    %c0_68 = arith.constant 0 : index
    %c0_69 = arith.constant 0 : index
    %92 = vector.load %arg11[%c0_68, %c0_69] : memref<1x64xf32, #tpu.memory_space<vmem>>, vector<1x64xf32>
    %93 = vector.broadcast %92 : vector<1x64xf32> to vector<2x64xf32>
    %94 = arith.addf %91, %93 : vector<2x64xf32>
    %cst_70 = arith.constant 0.000000e+00 : f32
    %95 = vector.broadcast %cst_70 : f32 to vector<2x64xf32>
    %96 = arith.maximumf %94, %95 : vector<2x64xf32>
    %c0_71 = arith.constant 0 : index
    %c0_72 = arith.constant 0 : index
    %97 = vector.load %arg12[%c0_71, %c0_72] : memref<1x64xf32, #tpu.memory_space<vmem>>, vector<1x64xf32>
    %98 = vector.broadcast %97 : vector<1x64xf32> to vector<2x64xf32>
    %99 = arith.mulf %96, %98 : vector<2x64xf32>
    %cst_73 = arith.constant dense<0.000000e+00> : vector<2xf32>
    %100 = vector.multi_reduction <add>, %99, %cst_73 [1] : vector<2x64xf32> to vector<2xf32>
    %101 = vector.shape_cast %100 : vector<2xf32> to vector<2x1xf32>
    %c0_74 = arith.constant 0 : index
    %c0_75 = arith.constant 0 : index
    %102 = vector.load %arg13[%c0_74, %c0_75] : memref<1x1xf32, #tpu.memory_space<vmem>>, vector<1x1xf32>
    %103 = vector.broadcast %102 : vector<1x1xf32> to vector<2x1xf32>
    %104 = arith.addf %101, %103 : vector<2x1xf32>
    %105 = arith.negf %104 : vector<2x1xf32>
    %106 = math.exp %105 : vector<2x1xf32>
    %cst_76 = arith.constant 1.000000e+00 : f32
    %107 = vector.broadcast %cst_76 : f32 to vector<2x1xf32>
    %108 = arith.addf %107, %106 : vector<2x1xf32>
    %109 = arith.divf %107, %108 : vector<2x1xf32>
    %c0_77 = arith.constant 0 : index
    %c0_78 = arith.constant 0 : index
    %110 = vector.load %arg14[%c0_77, %c0_78] : memref<2x1xf32, #tpu.memory_space<vmem>>, vector<2x1xf32>
    tpu.vector_store %arg14[%c0_77, %c0_78], %109 {strides = array<i32>} : memref<2x1xf32, #tpu.memory_space<vmem>>, vector<2x1xf32>,
    return
  }
  func.func @transform_0(%arg0: i32) -> (i32, i32, i32) {
    %c0_i32 = arith.constant 0 : i32
    %c0_i32_0 = arith.constant 0 : i32
    %c0_i32_1 = arith.constant 0 : i32
    return %arg0, %c0_i32, %c0_i32_0 : i32, i32, i32
  }
  func.func @transform_1(%arg0: i32) -> (i32, i32, i32) {
    %c0_i32 = arith.constant 0 : i32
    %c0_i32_0 = arith.constant 0 : i32
    %c0_i32_1 = arith.constant 0 : i32
    %c0_i32_2 = arith.constant 0 : i32
    return %c0_i32, %c0_i32_0, %c0_i32_1 : i32, i32, i32
  }
  func.func @transform_2(%arg0: i32) -> (i32, i32) {
    %c0_i32 = arith.constant 0 : i32
    %c0_i32_0 = arith.constant 0 : i32
    %c0_i32_1 = arith.constant 0 : i32
    return %c0_i32, %c0_i32_0 : i32, i32
  }
  func.func @transform_3(%arg0: i32) -> (i32, i32) {
    %c0_i32 = arith.constant 0 : i32
    %c0_i32_0 = arith.constant 0 : i32
    %c0_i32_1 = arith.constant 0 : i32
    return %c0_i32, %c0_i32_0 : i32, i32
  }
  func.func @transform_4(%arg0: i32) -> (i32, i32) {
    %c0_i32 = arith.constant 0 : i32
    %c0_i32_0 = arith.constant 0 : i32
    %c0_i32_1 = arith.constant 0 : i32
    return %c0_i32, %c0_i32_0 : i32, i32
  }
  func.func @transform_5(%arg0: i32) -> (i32, i32) {
    %c0_i32 = arith.constant 0 : i32
    %c0_i32_0 = arith.constant 0 : i32
    %c0_i32_1 = arith.constant 0 : i32
    return %c0_i32, %c0_i32_0 : i32, i32
  }
  func.func @transform_6(%arg0: i32) -> (i32, i32) {
    %c0_i32 = arith.constant 0 : i32
    %c0_i32_0 = arith.constant 0 : i32
    %c0_i32_1 = arith.constant 0 : i32
    return %c0_i32, %c0_i32_0 : i32, i32
  }
  func.func @transform_7(%arg0: i32) -> (i32, i32, i32) {
    %c0_i32 = arith.constant 0 : i32
    %c0_i32_0 = arith.constant 0 : i32
    %c0_i32_1 = arith.constant 0 : i32
    %c0_i32_2 = arith.constant 0 : i32
    return %c0_i32, %c0_i32_0, %c0_i32_1 : i32, i32, i32
  }
  func.func @transform_8(%arg0: i32) -> (i32, i32) {
    %c0_i32 = arith.constant 0 : i32
    %c0_i32_0 = arith.constant 0 : i32
    %c0_i32_1 = arith.constant 0 : i32
    return %c0_i32, %c0_i32_0 : i32, i32
  }
  func.func @transform_9(%arg0: i32) -> (i32, i32) {
    %c0_i32 = arith.constant 0 : i32
    %c0_i32_0 = arith.constant 0 : i32
    %c0_i32_1 = arith.constant 0 : i32
    return %c0_i32, %c0_i32_0 : i32, i32
  }
  func.func @transform_10(%arg0: i32) -> (i32, i32) {
    %c0_i32 = arith.constant 0 : i32
    %c0_i32_0 = arith.constant 0 : i32
    %c0_i32_1 = arith.constant 0 : i32
    return %c0_i32, %c0_i32_0 : i32, i32
  }
  func.func @transform_11(%arg0: i32) -> (i32, i32) {
    %c0_i32 = arith.constant 0 : i32
    %c0_i32_0 = arith.constant 0 : i32
    %c0_i32_1 = arith.constant 0 : i32
    return %c0_i32, %c0_i32_0 : i32, i32
  }
  func.func @transform_12(%arg0: i32) -> (i32, i32) {
    %c0_i32 = arith.constant 0 : i32
    %c0_i32_0 = arith.constant 0 : i32
    %c0_i32_1 = arith.constant 0 : i32
    return %c0_i32, %c0_i32_0 : i32, i32
  }
  func.func @transform_13(%arg0: i32) -> (i32, i32) {
    %c0_i32 = arith.constant 0 : i32
    %c0_i32_0 = arith.constant 0 : i32
    return %arg0, %c0_i32 : i32, i32
  }
}

</mosaic_0001>

<bundles_post_ra>
// kernel: fraud_cnn_forward.1
= control target key start
LH: loop header
LB: loop body
LE: loop exit
PB: predicated region body
PF: predicated region fallthrough
CT: control target
= control target key end

     0   :  { %vm50_vm0 = vcmask 7168   ;;  %v1516_v0 = vmov 0   ;;  %v1517_v3 = vmov 0.0   ;;  %vm401_vm1 = vcmask 261120   ;;  %s1520_s28 = smov 64   ;;  %s1981_s0 = inlined_call_operand.vmem [shape: f32[2,16,1], index: 0, kind: input, shape index: {}]   ;;  %s1982_s4 = inlined_call_operand.vmem [shape: f32[96,64], index: 4, kind: input, shape index: {}]   ;;  %s1983_s1 = inlined_call_operand.vmem [shape: f32[3,1,32], index: 1, kind: input, shape index: {}]   ;;  %s1984_s2 = inlined_call_operand.vmem [shape: f32[1,32], index: 2, kind: input, shape index: {}]   ;;  %s1985_s3 = inlined_call_operand.vmem [shape: f32[1,32], index: 3, kind: input, shape index: {}]   ;;  %s1986_s7 = inlined_call_operand.vmem [shape: f32[4,64,128], index: 7, kind: input, shape index: {}]   ;;  %s1987_s5 = inlined_call_operand.vmem [shape: f32[1,64], index: 5, kind: input, shape index: {}]   ;;  %s1988_s6 = inlined_call_operand.vmem [shape: f32[1,64], index: 6, kind: input, shape index: {}]   ;;  %s1989_s9 = inlined_call_operand.vmem [shape: f32[128,64], index: 9, kind: input, shape index: {}]   ;;  %s1990_s8 = inlined_call_operand.vmem [shape: f32[1,128], index: 8, kind: input, shape index: {}]   ;;  %s1991_s12 = inlined_call_operand.<no memory space> [shape: f32[1,1], index: 12, kind: input, shape index: {}]   ;;  %s1992_s10 = inlined_call_operand.vmem [shape: f32[1,64], index: 10, kind: input, shape index: {}]   ;;  %s1993_s11 = inlined_call_operand.vmem [shape: f32[1,64], index: 11, kind: input, shape index: {}]   ;;  %s1994_s13 = inlined_call_operand.vmem [shape: f32[2,1], index: 13, kind: output, shape index: {}]  }
   0x1   :  { %1511 = vset.pattern.permute.xlu1 %v1516_v0  ;;  %1510 = vset.pattern.permute.xlu0 %v1516_v0  ;;  %v48_v1 = vld [vmem:[%s1981_s0 + $0x10] sm:$0xff]  ;;  %v49_v2 = vld [vmem:[%s1981_s0 + $0x18] sm:$0xff]  ;;  %53 = vst.msk [vmem:[#allocation2 + $0x10] sm:$0xff] %vm50_vm0, %v1517_v3  ;;  %56 = vst.msk [vmem:[#allocation2 + $0x28] sm:$0xff] %vm50_vm0, %v1517_v3  ;;  %v1518_v36 = vmov 1983009808   ;;  %v208_v38 = vlaneseq }
   0x2   :  { %57 = vst.msk [vmem:[#allocation2 + $0x30] sm:$0xff] %vm50_vm0, %v1517_v3  ;;  %v47_v4 = vld [vmem:[%s1981_s0 + $0x8] sm:$0xff]  ;;  %51 = vst.msk [vmem:[#allocation2] sm:$0xff] %vm50_vm0, %v1517_v3  ;;  %77 = vperm.xlu1 %1511, %v48_v1   ;;  %v46_v5 = vld [vmem:[%s1981_s0] sm:$0xff]  ;;  %v206_v37 = vunpack.c.l.s4 %v1518_v36  ;;  %vm288_vm2 = vcmask 254976   ;;  %vm424_vm3 = vcmask 1041409  }
   0x3   :  { %52 = vst.msk [vmem:[#allocation2 + $0x8] sm:$0xff] %vm50_vm0, %v1517_v3  ;;  %54 = vst.msk [vmem:[#allocation2 + $0x18] sm:$0xff] %vm50_vm0, %v1517_v3  ;;  %67 = vperm.xlu0 %1510, %v46_v5   ;;  %v472_v14 = vld [vmem:[%s1982_s4] sm:$0xff]  ;;  %v473_v15 = vld [vmem:[%s1982_s4 + $0x8] sm:$0xff]  ;;  %v209_v48 = vshrl.u32 %v208_v38, 7  ;;  %vm426_vm4 = vcmask 1042434  }
   0x4   :  { %55 = vst.msk [vmem:[#allocation2 + $0x20] sm:$0xff] %vm50_vm0, %v1517_v3  ;;  %58 = vst.msk [vmem:[#allocation2 + $0x38] sm:$0xff] %vm50_vm0, %v1517_v3  ;;  %v474_v16 = vld [vmem:[%s1982_s4 + $0x10] sm:$0xff]  ;;  %v1407_v17 = vpack.c.bf16 %v473_v15, %v472_v14  ;;  %v475_v18 = vld [vmem:[%s1982_s4 + $0x18] sm:$0xff]  ;;  %v207_v47 = vunpack.c.0.s8 %v206_v37  ;;  %vm428_vm5 = vcmask 1043459   ;;  %vm430_vm6 = vcmask 1044484  }
   0x5   :  { %62 = vst.msk [vmem:[#allocation2 + $0x30] sm:$0xff] %vm50_vm0, %v49_v2  ;;  %60 = vst.msk [vmem:[#allocation2 + $0x10] sm:$0xff] %vm50_vm0, %v47_v4  ;;  %v1411_v19 = vpack.c.bf16 %v475_v18, %v474_v16  ;;  %v476_v20 = vld [vmem:[%s1982_s4 + $0x20] sm:$0xff]  ;;  %v477_v21 = vld [vmem:[%s1982_s4 + $0x28] sm:$0xff]  ;;  %vm432_vm7 = vcmask 1045509   ;;  %vm434_vm8 = vcmask 1046534  }
   0x6   :  { %61 = vst.msk [vmem:[#allocation2 + $0x28] sm:$0xff] %vm50_vm0, %v48_v1  ;;  %59 = vst.msk [vmem:[#allocation2 + $0x8] sm:$0xff] %vm50_vm0, %v46_v5  ;;  %1408 = vmatprep.subr.bf16.mxu0 %v1407_v17  ;;  %v1415_v22 = vpack.c.bf16 %v477_v21, %v476_v20  ;;  %v478_v23 = vld [vmem:[%s1982_s4 + $0x30] sm:$0xff]  ;;  %v479_v24 = vld [vmem:[%s1982_s4 + $0x38] sm:$0xff]  ;;  %v1690_v56 = vsub.s32 %v207_v47, %v209_v48  ;;  %vm436_vm9 = vcmask 1047559   ;;  %vm469_vm10 = vcmask 523264  }
   0x7   :  { %406 = vst.msk [vmem:[#allocation3 + $0x20] sm:$0xff] %vm401_vm1, %v1517_v3  ;;  %402 = vst.msk [vmem:[#allocation3] sm:$0xff] %vm401_vm1, %v1517_v3  ;;  %1410 = vmatpush3.bf16.msra.mxu0 %v1407_v17  ;;  %v1419_v25 = vpack.c.bf16 %v479_v24, %v478_v23  ;;  %v1160_v28 = vld [vmem:[%s1983_s1] ss:$0 sm:$0xff]  ;;  %v1667_v29 = vld [vmem:[%s1983_s1 + $0x1] ss:$0 sm:$0xff] }
   0x8   :  { %403 = vst.msk [vmem:[#allocation3 + $0x8] sm:$0xff] %vm401_vm1, %v1517_v3  ;;  %404 = vst.msk [vmem:[#allocation3 + $0x10] sm:$0xff] %vm401_vm1, %v1517_v3  ;;  %1412 = vmatprep.subr.bf16.mxu0 %v1411_v19  ;;  %v1672_v34 = vld [vmem:[%s1983_s1 + $0x2] ss:$0 sm:$0xff]  ;;  %v1680_v45 = vld [vmem:[%s1984_s2] ss:$0 sm:$0xff] }
   0x9   :  { %405 = vst.msk [vmem:[#allocation3 + $0x18] sm:$0xff] %vm401_vm1, %v1517_v3  ;;  %407 = vst.msk [vmem:[#allocation3 + $0x28] sm:$0xff] %vm401_vm1, %v1517_v3  ;;  %v1686_v50 = vld [vmem:[%s1985_s3] ss:$0 sm:$0xff]  ;;  %vm484_vm11 = vcmask 785408   ;;  %vm1522_vm12 = vmmov 0  }
   0xa   :  { %1312 = vmatprep.mubr.msk.f32.mxu1 %vm1522_vm12, %v1517_v3  ;;  %vm630_vm13 = vcmask 517120   ;;  %vm1152_vm14 = vcmask 1024  }
   0xb   :  { %1414 = vmatpush3.bf16.msra.mxu0 %v1411_v19 }
   0xc   :  { %v137_v12 = vld [vmem:[#allocation2 + $0x31] sm:$0xff]  ;;  %1416 = vmatprep.subr.bf16.mxu0 %v1415_v22 }
   0xd   :  { %v97_v6 = vld [vmem:[#allocation2 + $0x27] sm:$0xff]  ;;  %v96_v10 = vld [vmem:[#allocation2 + $0xf] sm:$0xff] }
   0xe   :  { %112 = vperm.xlu1 %1511, %v97_v6   ;;  %v95_v7 = vld [vmem:[#allocation2 + $0x7] sm:$0xff]  ;;  %v98_v11 = vld [vmem:[#allocation2 + $0x2f] sm:$0xff] }
   0xf   :  { %102 = vperm.xlu0 %1510, %v95_v7   ;;  %v136_v8 = vld [vmem:[#allocation2 + $0x29] sm:$0xff]  ;;  %v135_v13 = vld [vmem:[#allocation2 + $0x11] sm:$0xff]  ;;  %1418 = vmatpush3.bf16.msra.mxu0 %v1415_v22 }
  0x10   :  { %v134_v9 = vld [vmem:[#allocation2 + $0x9] sm:$0xff]  ;;  %1420 = vmatprep.subr.bf16.mxu0 %v1419_v25 }
  0x12   :  { %152 = vperm.xlu1 %1511, %v136_v8  }
  0x13   :  { %142 = vperm.xlu0 %1510, %v134_v9   ;;  %1422 = vmatpush3.bf16.msra.mxu0 %v1419_v25 }
  0x16   :  { %107 = vperm.xlu1 %1511, %v96_v10  }
  0x17   :  { %72 = vperm.xlu0 %1510, %v47_v4  }
  0x1a   :  { %117 = vperm.xlu1 %1511, %v98_v11  }
  0x1b   :  { %82 = vperm.xlu0 %1510, %v49_v2  }
  0x1e   :  { %157 = vperm.xlu1 %1511, %v137_v12  }
  0x1f   :  { %147 = vperm.xlu0 %1510, %v135_v13  }
  0x81   :  { %v78_v26 = vpop.permute.xlu1 %77 }
  0x82   :  { %v68_v27 = vpop.permute.xlu0 %67  ;;  %v93_v35 = vmul.f32 %v1667_v29, %v78_v26 }
  0x83   :  { %v91_v39 = vmul.f32 %v1667_v29, %v68_v27 }
  0x8d   :  { %v113_v30 = vpop.permute.xlu1 %112 }
  0x8e   :  { %v128_v31 = vmul.f32 %v1160_v28, %v113_v30  ;;  %v103_v32 = vpop.permute.xlu0 %102 }
  0x8f   :  { %v126_v33 = vmul.f32 %v1160_v28, %v103_v32 }
  0x90   :  { %v132_v41 = vadd.f32 %v128_v31, %v93_v35 }
  0x91   :  { %v153_v40 = vpop.permute.xlu1 %152  ;;  %v130_v44 = vadd.f32 %v126_v33, %v91_v39 }
  0x92   :  { %v168_v42 = vmul.f32 %v1672_v34, %v153_v40  ;;  %v143_v43 = vpop.permute.xlu0 %142 }
  0x93   :  { %v166_v46 = vmul.f32 %v1672_v34, %v143_v43 }
  0x94   :  { %v172_v49 = vadd.f32 %v168_v42, %v132_v41 }
  0x95   :  { %v170_v51 = vadd.f32 %v166_v46, %v130_v44  ;;  %v108_v52 = vpop.permute.xlu1 %107 }
  0x96   :  { %v183_v53 = vmul.f32 %v1680_v45, %v172_v49  ;;  %v73_v54 = vpop.permute.xlu0 %72  ;;  %v127_v4 = vmul.f32 %v1160_v28, %v108_v52 }
  0x97   :  { %v181_v55 = vmul.f32 %v1680_v45, %v170_v51  ;;  %v92_v36 = vmul.f32 %v1667_v29, %v73_v54 }
  0x98   :  { %v194_v57 = vadd.f32 %v1686_v50, %v183_v53 }
  0x99   :  { %v192_v58 = vadd.f32 %v1686_v50, %v181_v55  ;;  %v118_v60 = vpop.permute.xlu1 %117 }
  0x9a   :  { %v198_v59 = vmax.f32 %v194_v57, 0.0  ;;  %v83_v62 = vpop.permute.xlu0 %82  ;;  %v129_v5 = vmul.f32 %v1160_v28, %v118_v60 }
  0x9b   :  { %v196_v61 = vmax.f32 %v192_v58, 0.0  ;;  %v94_v9 = vmul.f32 %v1667_v29, %v83_v62 }
  0x9c   :  { %v238_v63 = vcombine.high %v198_v59, %v198_v59  ;;  %v245_v0 = vrot.slane %v198_v59, %v1690_v56 }
  0x9d   :  { %v204_v1 = vcombine.high %v196_v61, %v196_v61  ;;  %v211_v2 = vrot.slane %v196_v61, %v1690_v56  ;;  %v158_v26 = vpop.permute.xlu1 %157  ;;  %v133_v49 = vadd.f32 %v129_v5, %v94_v9 }
  0x9e   :  { %v252_v6 = vrot.slane %v238_v63, %v1690_v56  ;;  %v253_v7 = vcombine.high %v245_v0, %v245_v0  ;;  %v345_v8 = vsel %vm288_vm2, %v245_v0, -inf  ;;  %v169_v40 = vmul.f32 %v1672_v34, %v158_v26  ;;  %v148_v57 = vpop.permute.xlu0 %147 }
  0x9f   :  { %v346_v10 = vrot.slane %v345_v8, 4  ;;  %v218_v11 = vrot.slane %v204_v1, %v1690_v56  ;;  %v219_v12 = vcombine.high %v211_v2, %v211_v2  ;;  %v289_v13 = vsel %vm288_vm2, %v211_v2, -inf }
  0xa0   :  { %v254_v14 = vcombine.high %v252_v6, %v252_v6  ;;  %v352_v15 = vsel %vm288_vm2, %v253_v7, -inf  ;;  %v359_v16 = vsel %vm288_vm2, %v252_v6, -inf  ;;  %v290_v17 = vrot.slane %v289_v13, 4 }
  0xa1   :  { %v347_v18 = vmax.f32 %v345_v8, %v346_v10  ;;  %v353_v19 = vrot.slane %v352_v15, 4  ;;  %v360_v20 = vrot.slane %v359_v16, 4  ;;  %v220_v21 = vcombine.high %v218_v11, %v218_v11 }
  0xa2   :  { %v366_v22 = vsel %vm288_vm2, %v254_v14, -inf  ;;  %v291_v23 = vmax.f32 %v289_v13, %v290_v17  ;;  %v296_v24 = vsel %vm288_vm2, %v219_v12, -inf  ;;  %v303_v25 = vsel %vm288_vm2, %v218_v11, -inf }
  0xa3   :  { %v348_v27 = vrot.slane %v347_v18, 2  ;;  %v354_v28 = vmax.f32 %v352_v15, %v353_v19  ;;  %v361_v30 = vmax.f32 %v359_v16, %v360_v20  ;;  %v367_v31 = vrot.slane %v366_v22, 4 }
  0xa4   :  { %v297_v32 = vrot.slane %v296_v24, 4  ;;  %v304_v33 = vrot.slane %v303_v25, 4  ;;  %v310_v35 = vsel %vm288_vm2, %v220_v21, -inf  ;;  %v292_v41 = vrot.slane %v291_v23, 2 }
  0xa5   :  { %v355_v37 = vrot.slane %v354_v28, 2  ;;  %v362_v38 = vrot.slane %v361_v30, 2  ;;  %v368_v39 = vmax.f32 %v366_v22, %v367_v31  ;;  %v311_v44 = vrot.slane %v310_v35, 4 }
  0xa6   :  { %v298_v42 = vmax.f32 %v296_v24, %v297_v32  ;;  %v305_v43 = vmax.f32 %v303_v25, %v304_v33  ;;  %v349_v46 = vmax.f32 %v347_v18, %v348_v27  ;;  %v173_v29 = vadd.f32 %v169_v40, %v133_v49 }
  0xa7   :  { %v356_v47 = vmax.f32 %v354_v28, %v355_v37  ;;  %v363_v48 = vmax.f32 %v361_v30, %v362_v38  ;;  %v369_v51 = vrot.slane %v368_v39, 2  ;;  %v312_v55 = vmax.f32 %v310_v35, %v311_v44 }
  0xa8   :  { %v299_v52 = vrot.slane %v298_v42, 2  ;;  %v306_v53 = vrot.slane %v305_v43, 2  ;;  %v293_v54 = vmax.f32 %v291_v23, %v292_v41  ;;  %v350_v62 = vrot.slane %v349_v46, 1 }
  0xa9   :  { %v357_v58 = vrot.slane %v356_v47, 1  ;;  %v313_v61 = vrot.slane %v312_v55, 2  ;;  %v131_v63 = vadd.f32 %v127_v4, %v92_v36  ;;  %v184_v0 = vmul.f32 %v1680_v45, %v173_v29 }
  0xaa   :  { %v300_v59 = vmax.f32 %v298_v42, %v299_v52  ;;  %v307_v60 = vmax.f32 %v305_v43, %v306_v53  ;;  %v167_v1 = vmul.f32 %v1672_v34, %v148_v57  ;;  %v364_v2 = vrot.slane %v363_v48, 1 }
  0xab   :  { %v370_v5 = vmax.f32 %v368_v39, %v369_v51  ;;  %v314_v7 = vmax.f32 %v312_v55, %v313_v61  ;;  %v358_v8 = vmax.f32 %v356_v47, %v357_v58  ;;  %v195_v9 = vadd.f32 %v1686_v50, %v184_v0 }
  0xac   :  { %v301_v6 = vrot.slane %v300_v59, 1  ;;  %v171_v10 = vadd.f32 %v167_v1, %v131_v63  ;;  %v294_v11 = vrot.slane %v293_v54, 1  ;;  %v308_v12 = vrot.slane %v307_v60, 1 }
  0xad   :  { %v371_v13 = vrot.slane %v370_v5, 1  ;;  %v351_v14 = vmax.f32 %v349_v46, %v350_v62  ;;  %v199_v15 = vmax.f32 %v195_v9, 0.0  ;;  %v365_v17 = vmax.f32 %v363_v48, %v364_v2 }
  0xae   :  { %v182_v4 = vmul.f32 %v1680_v45, %v171_v10  ;;  %v302_v16 = vmax.f32 %v300_v59, %v301_v6  ;;  %v315_v34 = vrot.slane %v314_v7, 1  ;;  %v295_v22 = vmax.f32 %v293_v54, %v294_v11 }
  0xaf   :  { %v255_v18 = vcombine.high %v199_v15, %v199_v15  ;;  %v262_v19 = vrot.slane %v199_v15, %v1690_v56  ;;  %v438_v21 = vsel %vm424_vm3, %v358_v8, %v351_v14  ;;  %v372_v23 = vmax.f32 %v370_v5, %v371_v13 }
  0xb0   :  { %v193_v20 = vadd.f32 %v1686_v50, %v182_v4  ;;  %v309_v24 = vmax.f32 %v307_v60, %v308_v12  ;;  %v439_v30 = vsel %vm426_vm4, %v365_v17, %v438_v21  ;;  %v1719_v31 = vmax.f32 %v314_v7, %v315_v34  ;;  %v481_v17 = vld [vmem:[%s1982_s4 + $0x48] sm:$0xff] }
  0xb1   :  { %v269_v25 = vrot.slane %v255_v18, %v1690_v56  ;;  %v270_v26 = vcombine.high %v262_v19, %v262_v19  ;;  %v373_v45 = vsel %vm288_vm2, %v262_v19, -inf  ;;  %v425_v32 = vsel %vm424_vm3, %v302_v16, %v295_v22  ;;  %v480_v16 = vld [vmem:[%s1982_s4 + $0x40] sm:$0xff] }
  0xb2   :  { %v197_v27 = vmax.f32 %v193_v20, 0.0  ;;  %v374_v28 = vrot.slane %v373_v45, 4  ;;  %v440_v43 = vsel %vm428_vm5, %v372_v23, %v439_v30  ;;  %v427_v44 = vsel %vm426_vm4, %v309_v24, %v425_v32 }
  0xb3   :  { %v271_v50 = vcombine.high %v269_v25, %v269_v25  ;;  %v380_v33 = vsel %vm288_vm2, %v270_v26, -inf  ;;  %v387_v35 = vsel %vm288_vm2, %v269_v25, -inf  ;;  %v482_v25 = vld [vmem:[%s1982_s4 + $0x50] sm:$0xff]  ;;  %v483_v26 = vld [vmem:[%s1982_s4 + $0x58] sm:$0xff]  ;;  %v1423_v30 = vpack.c.bf16 %v481_v17, %v480_v16  ;;  %s1519_s4 = smov 32  }
  0xb4   :  { %v221_v36 = vcombine.high %v197_v27, %v197_v27  ;;  %v375_v37 = vmax.f32 %v373_v45, %v374_v28  ;;  %v381_v38 = vrot.slane %v380_v33, 4  ;;  %v388_v39 = vrot.slane %v387_v35, 4 }
  0xb5   :  { %v228_v40 = vrot.slane %v197_v27, %v1690_v56  ;;  %v394_v42 = vsel %vm288_vm2, %v271_v50, -inf  ;;  %1424 = vmatprep.subr.bf16.mxu0 %v1423_v30 }
  0xb6   :  { %v235_v41 = vrot.slane %v221_v36, %v1690_v56  ;;  %v376_v46 = vrot.slane %v375_v37, 2  ;;  %v382_v47 = vmax.f32 %v380_v33, %v381_v38  ;;  %v389_v55 = vmax.f32 %v387_v35, %v388_v39  ;;  %1426 = vmatpush3.bf16.msra.mxu0 %v1423_v30 }
  0xb7   :  { %v236_v48 = vcombine.high %v228_v40, %v228_v40  ;;  %v317_v49 = vsel %vm288_vm2, %v228_v40, -inf  ;;  %v395_v62 = vrot.slane %v394_v42, 4  ;;  %v429_v35 = vsel %vm428_vm5, %v1719_v31, %v427_v44 }
  0xb8   :  { %v237_v51 = vcombine.high %v235_v41, %v235_v41  ;;  %v318_v52 = vrot.slane %v317_v49, 4  ;;  %v331_v53 = vsel %vm288_vm2, %v235_v41, -inf  ;;  %v377_v57 = vmax.f32 %v375_v37, %v376_v46 }
  0xb9   :  { %v324_v58 = vsel %vm288_vm2, %v236_v48, -inf  ;;  %v332_v29 = vrot.slane %v331_v53, 4  ;;  %v383_v54 = vrot.slane %v382_v47, 2  ;;  %v390_v61 = vrot.slane %v389_v55, 2 }
  0xba   :  { %v319_v59 = vmax.f32 %v317_v49, %v318_v52  ;;  %v325_v60 = vrot.slane %v324_v58, 4  ;;  %v378_v63 = vrot.slane %v377_v57, 1  ;;  %v338_v2 = vsel %vm288_vm2, %v237_v51, -inf }
  0xbb   :  { %v384_v0 = vmax.f32 %v382_v47, %v383_v54  ;;  %v333_v1 = vmax.f32 %v331_v53, %v332_v29  ;;  %v391_v7 = vmax.f32 %v389_v55, %v390_v61  ;;  %v396_v8 = vmax.f32 %v394_v42, %v395_v62  ;;  %v1169_v62 = vld [vmem:[%s1986_s7 + $0x40] sm:$0xff] }
  0xbc   :  { %v320_v6 = vrot.slane %v319_v59, 2  ;;  %v326_v5 = vmax.f32 %v324_v58, %v325_v60  ;;  %v379_v9 = vmax.f32 %v377_v57, %v378_v63  ;;  %v339_v12 = vrot.slane %v338_v2, 4  ;;  %v1170_v63 = vld [vmem:[%s1986_s7 + $0x48] sm:$0xff] }
  0xbd   :  { %v385_v10 = vrot.slane %v384_v0, 1  ;;  %v334_v11 = vrot.slane %v333_v1, 2  ;;  %v392_v14 = vrot.slane %v391_v7, 1  ;;  %v397_v15 = vrot.slane %v396_v8, 2 }
  0xbe   :  { %v321_v13 = vmax.f32 %v319_v59, %v320_v6  ;;  %v327_v4 = vrot.slane %v326_v5, 2  ;;  %v441_v18 = vsel %vm430_vm6, %v379_v9, %v440_v43  ;;  %v340_v20 = vmax.f32 %v338_v2, %v339_v12  ;;  %v1171_v2 = vld [vmem:[%s1986_s7 + $0x50] sm:$0xff]  ;;  %v1172_v6 = vld [vmem:[%s1986_s7 + $0x58] sm:$0xff] }
  0xbf   :  { %v386_v34 = vmax.f32 %v384_v0, %v385_v10  ;;  %v335_v19 = vmax.f32 %v333_v1, %v334_v11  ;;  %v393_v21 = vmax.f32 %v391_v7, %v392_v14  ;;  %v398_v22 = vmax.f32 %v396_v8, %v397_v15  ;;  %v1173_v7 = vld [vmem:[%s1986_s7 + $0x60] sm:$0xff]  ;;  %v1174_v8 = vld [vmem:[%s1986_s7 + $0x68] sm:$0xff]  ;;  %v1175_v10 = vld [vmem:[%s1986_s7 + $0x70] sm:$0xff] }
  0xc0   :  { %v322_v23 = vrot.slane %v321_v13, 1  ;;  %v328_v24 = vmax.f32 %v326_v5, %v327_v4  ;;  %v341_v28 = vrot.slane %v340_v20, 2  ;;  %v1427_v39 = vpack.c.bf16 %v483_v26, %v482_v25  ;;  %v1176_v11 = vld [vmem:[%s1986_s7 + $0x78] sm:$0xff]  ;;  %v1168_v15 = vld [vmem:[%s1988_s6] ss:$0 sm:$0xff] }
  0xc1   :  { %v442_v45 = vsel %vm432_vm7, %v386_v34, %v441_v18  ;;  %v336_v27 = vrot.slane %v335_v19, 1  ;;  %v399_v32 = vrot.slane %v398_v22, 1  ;;  %v1432_v0 = vpack.c.bf16 %v1170_v63, %v1169_v62 }
  0xc2   :  { %v323_v50 = vmax.f32 %v321_v13, %v322_v23  ;;  %v329_v33 = vrot.slane %v328_v24, 1  ;;  %v443_v36 = vsel %vm434_vm8, %v393_v21, %v442_v45  ;;  %v342_v38 = vmax.f32 %v340_v20, %v341_v28  ;;  %1428 = vmatprep.subr.bf16.mxu0 %v1427_v39  ;;  %v1167_v13 = vld [vmem:[%s1987_s5] ss:$0 sm:$0xff] }
  0xc3   :  { %v337_v37 = vmax.f32 %v335_v19, %v336_v27  ;;  %v400_v40 = vmax.f32 %v398_v22, %v399_v32  ;;  %1430 = vmatpush3.bf16.msra.mxu0 %v1427_v39  ;;  %v1521_v1 = vmov 0.0|0.0   ;;  %v1435_v5 = vpack.c.bf16 %v1172_v6, %v1171_v2 }
  0xc4   :  { %v330_v41 = vmax.f32 %v328_v24, %v329_v33  ;;  %v431_v42 = vsel %vm430_vm6, %v323_v50, %v429_v35  ;;  %v343_v43 = vrot.slane %v342_v38, 1  ;;  %1431 = vmatprep.subr.bf16.mxu1 %v1521_v1  ;;  %1479 = vmatprep.subr.bf16.mxu0 %v1521_v1  ;;  %v1438_v9 = vpack.c.bf16 %v1174_v8, %v1173_v7 }
  0xc5   :  { %v444_v46 = vsel %vm436_vm9, %v400_v40, %v443_v36  ;;  %1433 = vmatpush3.bf16.msra.mxu1 %v1432_v0  ;;  %v1441_v12 = vpack.c.bf16 %v1176_v11, %v1175_v10 }
  0xc6   :  { %v433_v47 = vsel %vm432_vm7, %v330_v41, %v431_v42  ;;  %455 = vrot.lane.b32.xlu1 %v444_v46, %s1519_s4  ;;  %448 = vst.msk [vmem:[#allocation3 + $0x20] sm:$0xff] %vm401_vm1, %v444_v46  ;;  %v344_v31 = vmax.f32 %v342_v38, %v343_v43  ;;  %1434 = vmatprep.subr.bf16.mxu1 %v1521_v1 }
  0xc7   :  { %v435_v44 = vsel %vm434_vm8, %v337_v37, %v433_v47 }
  0xc8   :  { %v437_v48 = vsel %vm436_vm9, %v344_v31, %v435_v44 }
  0xc9   :  { %453 = vrot.lane.b32.xlu0 %v437_v48, %s1519_s4  ;;  %447 = vst.msk [vmem:[#allocation3 + $0x8] sm:$0xff] %vm401_vm1, %v437_v48  ;;  %1436 = vmatpush3.bf16.msra.mxu1 %v1435_v5 }
  0xca   :  { %1437 = vmatprep.subr.bf16.mxu1 %v1521_v1 }
  0xcd   :  { %v452_v49 = vld [vmem:[#allocation3 + $0x21] sm:$0xff]  ;;  %1439 = vmatpush3.bf16.msra.mxu1 %v1438_v9 }
  0xce   :  { %463 = vrot.lane.b32.xlu1 %v452_v49, %s1520_s28  ;;  %v450_v57 = vld [vmem:[#allocation3 + $0x1f] sm:$0xff]  ;;  %1440 = vmatprep.subr.bf16.mxu1 %v1521_v1 }
  0xd0   :  { %v451_v51 = vld [vmem:[#allocation3 + $0x9] sm:$0xff] }
  0xd1   :  { %461 = vrot.lane.b32.xlu0 %v451_v51, %s1520_s28  ;;  %v449_v29 = vld [vmem:[#allocation3 + $0x7] sm:$0xff]  ;;  %1442 = vmatpush3.bf16.msra.mxu1 %v1441_v12 }
  0xd2   :  { %1443 = vmatprep.subr.bf16.mxu1 %v1521_v1 }
 0x138   :  { %v456_v52 = vpop.permute.xlu1 %455 }
 0x139   :  { %v468_v58 = vsel %vm401_vm1, %v450_v57, %v456_v52 }
 0x13b   :  { %v454_v53 = vpop.permute.xlu0 %453 }
 0x13c   :  { %v467_v54 = vsel %vm401_vm1, %v449_v29, %v454_v53 }
 0x140   :  { %v464_v55 = vpop.permute.xlu1 %463 }
 0x141   :  { %v471_v59 = vsel %vm469_vm10, %v468_v58, %v464_v55 }
 0x143   :  { %v462_v60 = vpop.permute.xlu0 %461 }
 0x144   :  { %v470_v61 = vsel %vm469_vm10, %v467_v54, %v462_v60 }
 0x145   :  { %1293 = vmatprep.mubr.msk.f32.mxu0 %vm484_vm11, %v470_v61 }
 0x146   :  { %1294 = vmatmul.mubr.msk.f32.vlgmr.msra.gmra.mrb[0].mxu0 %vm484_vm11, %v471_v59 }
 0x147   :  { %1404 = vmatprep.mubr.msk.f32.mxu0 %vm1522_vm12, %v1517_v3 }
 0x219   :  { %v1295_v14 = vpop.f32.mrb[0].mxu0 }
 0x21a   :  { %v574_v4 = vmul.f32 %v1295_v14, %v1167_v13  ;;  %v557_v16 = vpop.f32.mrb[1].mxu0 }
 0x21b   :  { %v573_v17 = vmul.f32 %v1167_v13, %v557_v16  ;;  %v688_v16 = vld [vmem:[%s1986_s7 + $0x8] sm:$0xff] }
 0x21c   :  { %v583_v34 = vadd.f32 %v1168_v15, %v574_v4  ;;  %v687_v4 = vld [vmem:[%s1986_s7] sm:$0xff] }
 0x21d   :  { %v582_v18 = vadd.f32 %v1168_v15, %v573_v17 }
 0x21e   :  { %v585_v19 = vmax.f32 %v583_v34, 0.0 }
 0x21f   :  { %v584_v20 = vmax.f32 %v582_v18, 0.0 }
 0x220   :  { %v605_v21 = vcombine.high %v585_v19, %v585_v19  ;;  %v612_v22 = vrot.slane %v585_v19, %v1690_v56 }
 0x221   :  { %v588_v23 = vcombine.high %v584_v20, %v584_v20  ;;  %v595_v24 = vrot.slane %v584_v20, %v1690_v56 }
 0x222   :  { %v619_v25 = vrot.slane %v605_v21, %v1690_v56  ;;  %v620_v26 = vcombine.high %v612_v22, %v612_v22  ;;  %v659_v45 = vsel %vm630_vm13, %v612_v22, -inf }
 0x223   :  { %v660_v27 = vrot.slane %v659_v45, 4  ;;  %v602_v28 = vrot.slane %v588_v23, %v1690_v56  ;;  %v603_v30 = vcombine.high %v595_v24, %v595_v24  ;;  %v631_v32 = vsel %vm630_vm13, %v595_v24, -inf }
 0x224   :  { %v621_v50 = vcombine.high %v619_v25, %v619_v25  ;;  %v666_v33 = vsel %vm630_vm13, %v620_v26, -inf  ;;  %v673_v35 = vsel %vm630_vm13, %v619_v25, -inf  ;;  %v632_v36 = vrot.slane %v631_v32, 4 }
 0x225   :  { %v661_v37 = vmax.f32 %v659_v45, %v660_v27  ;;  %v667_v38 = vrot.slane %v666_v33, 4  ;;  %v674_v39 = vrot.slane %v673_v35, 4  ;;  %v604_v40 = vcombine.high %v602_v28, %v602_v28  ;;  %v689_v27 = vld [vmem:[%s1986_s7 + $0x10] sm:$0xff] }
 0x226   :  { %v680_v41 = vsel %vm630_vm13, %v621_v50, -inf  ;;  %v633_v42 = vmax.f32 %v631_v32, %v632_v36  ;;  %v638_v43 = vsel %vm630_vm13, %v603_v30, -inf  ;;  %v645_v56 = vsel %vm630_vm13, %v602_v28, -inf  ;;  %v690_v28 = vld [vmem:[%s1986_s7 + $0x18] sm:$0xff]  ;;  %v691_v36 = vld [vmem:[%s1986_s7 + $0x20] sm:$0xff] }
 0x227   :  { %v662_v46 = vrot.slane %v661_v37, 2  ;;  %v668_v47 = vmax.f32 %v666_v33, %v667_v38  ;;  %v675_v31 = vmax.f32 %v673_v35, %v674_v39  ;;  %v681_v44 = vrot.slane %v680_v41, 4  ;;  %v693_v39 = vld [vmem:[%s1986_s7 + $0x30] sm:$0xff] }
 0x228   :  { %v634_v48 = vrot.slane %v633_v42, 2  ;;  %v639_v49 = vrot.slane %v638_v43, 4  ;;  %v646_v51 = vrot.slane %v645_v56, 4  ;;  %v652_v52 = vsel %vm630_vm13, %v604_v40, -inf  ;;  %v694_v40 = vld [vmem:[%s1986_s7 + $0x38] sm:$0xff] }
 0x229   :  { %v663_v53 = vmax.f32 %v661_v37, %v662_v46  ;;  %v676_v55 = vrot.slane %v675_v31, 2  ;;  %v682_v57 = vmax.f32 %v680_v41, %v681_v44  ;;  %v653_v58 = vrot.slane %v652_v52, 4  ;;  %v692_v37 = vld [vmem:[%s1986_s7 + $0x28] sm:$0xff]  ;;  %v1181_v46 = vld [vmem:[%s1986_s7 + $0x90] sm:$0xff]  ;;  %v1183_v44 = vld [vmem:[%s1986_s7 + $0xa0] sm:$0xff] }
 0x22a   :  { %v635_v29 = vmax.f32 %v633_v42, %v634_v48  ;;  %v640_v54 = vmax.f32 %v638_v43, %v639_v49  ;;  %v647_v59 = vmax.f32 %v645_v56, %v646_v51  ;;  %v669_v60 = vrot.slane %v668_v47, 2  ;;  %v1179_v42 = vld [vmem:[%s1986_s7 + $0x80] sm:$0xff]  ;;  %v1180_v43 = vld [vmem:[%s1986_s7 + $0x88] sm:$0xff]  ;;  %v1185_v51 = vld [vmem:[%s1986_s7 + $0xb0] sm:$0xff] }
 0x22b   :  { %v664_v61 = vrot.slane %v663_v53, 1  ;;  %v677_v62 = vmax.f32 %v675_v31, %v676_v55  ;;  %v683_v63 = vrot.slane %v682_v57, 2  ;;  %v654_v0 = vmax.f32 %v652_v52, %v653_v58  ;;  %v1184_v48 = vld [vmem:[%s1986_s7 + $0xa8] sm:$0xff]  ;;  %v1186_v52 = vld [vmem:[%s1986_s7 + $0xb8] sm:$0xff]  ;;  %v1188_v55 = vld [vmem:[%s1986_s7 + $0xc0] sm:$0xff] }
 0x22c   :  { %v636_v2 = vrot.slane %v635_v29, 1  ;;  %v648_v6 = vrot.slane %v647_v59, 2  ;;  %v641_v5 = vrot.slane %v640_v54, 2  ;;  %v670_v7 = vmax.f32 %v668_v47, %v669_v60  ;;  %v1182_v47 = vld [vmem:[%s1986_s7 + $0x98] sm:$0xff]  ;;  %v1192_v60 = vld [vmem:[%s1986_s7 + $0xe0] sm:$0xff] }
 0x22d   :  { %v655_v8 = vrot.slane %v654_v0, 2  ;;  %v665_v9 = vmax.f32 %v663_v53, %v664_v61  ;;  %v678_v10 = vrot.slane %v677_v62, 1  ;;  %v684_v11 = vmax.f32 %v682_v57, %v683_v63  ;;  %v1189_v57 = vld [vmem:[%s1986_s7 + $0xc8] sm:$0xff]  ;;  %v1194_v63 = vld [vmem:[%s1986_s7 + $0xf0] sm:$0xff] }
 0x22e   :  { %v649_v12 = vmax.f32 %v647_v59, %v648_v6  ;;  %v642_v13 = vmax.f32 %v640_v54, %v641_v5  ;;  %v671_v14 = vrot.slane %v670_v7, 1  ;;  %v637_v15 = vmax.f32 %v635_v29, %v636_v2  ;;  %v1190_v29 = vld [vmem:[%s1986_s7 + $0xd0] sm:$0xff]  ;;  %v1191_v54 = vld [vmem:[%s1986_s7 + $0xd8] sm:$0xff]  ;;  %v1193_v61 = vld [vmem:[%s1986_s7 + $0xe8] sm:$0xff] }
 0x22f   :  { %v679_v17 = vmax.f32 %v677_v62, %v678_v10  ;;  %v656_v34 = vmax.f32 %v654_v0, %v655_v8  ;;  %v685_v18 = vrot.slane %v684_v11, 1  ;;  %v1444_v26 = vpack.c.bf16 %v688_v16, %v687_v4  ;;  %v1033_v2 = vld [vmem:[%s1989_s9] sm:$0xff]  ;;  %v1034_v6 = vld [vmem:[%s1989_s9 + $0x8] sm:$0xff]  ;;  %v1035_v5 = vld [vmem:[%s1989_s9 + $0x10] sm:$0xff] }
 0x230   :  { %v643_v19 = vrot.slane %v642_v13, 1  ;;  %v672_v20 = vmax.f32 %v670_v7, %v671_v14  ;;  %v781_v21 = vsel %vm424_vm3, %v665_v9, %v637_v15  ;;  %v650_v22 = vrot.slane %v649_v12, 1  ;;  %v1036_v8 = vld [vmem:[%s1989_s9 + $0x18] sm:$0xff]  ;;  %v1037_v10 = vld [vmem:[%s1989_s9 + $0x20] sm:$0xff]  ;;  %v1042_v16 = vld [vmem:[%s1989_s9 + $0x48] sm:$0xff] }
 0x231   :  { %v657_v23 = vrot.slane %v656_v34, 1  ;;  %v686_v24 = vmax.f32 %v684_v11, %v685_v18  ;;  %v1447_v35 = vpack.c.bf16 %v690_v28, %v689_v27  ;;  %v1450_v38 = vpack.c.bf16 %v692_v37, %v691_v36  ;;  %v1038_v11 = vld [vmem:[%s1989_s9 + $0x28] sm:$0xff]  ;;  %v1040_v14 = vld [vmem:[%s1989_s9 + $0x38] sm:$0xff]  ;;  %v1041_v15 = vld [vmem:[%s1989_s9 + $0x40] sm:$0xff] }
 0x232   :  { %v644_v25 = vmax.f32 %v642_v13, %v643_v19  ;;  %v651_v45 = vmax.f32 %v649_v12, %v650_v22  ;;  %v1453_v41 = vpack.c.bf16 %v694_v40, %v693_v39  ;;  %v1456_v56 = vpack.c.bf16 %v1180_v43, %v1179_v42  ;;  %v1039_v13 = vld [vmem:[%s1989_s9 + $0x30] sm:$0xff]  ;;  %v1044_v18 = vld [vmem:[%s1989_s9 + $0x58] sm:$0xff] }
 0x233   :  { %v658_v30 = vmax.f32 %v656_v34, %v657_v23  ;;  %v1459_v31 = vpack.c.bf16 %v1182_v47, %v1181_v46  ;;  %v1462_v49 = vpack.c.bf16 %v1184_v48, %v1183_v44  ;;  %v1465_v53 = vpack.c.bf16 %v1186_v52, %v1185_v51  ;;  %v1043_v34 = vld [vmem:[%s1989_s9 + $0x50] sm:$0xff]  ;;  %v1199_v46 = vld [vmem:[%s1993_s11] ss:$0 sm:$0xff] }
 0x234   :  { %v706_v32 = vsel %vm424_vm3, %v672_v20, %v644_v25  ;;  %v865_v50 = vsel %vm424_vm3, %v679_v17, %v651_v45  ;;  %v1468_v58 = vpack.c.bf16 %v1189_v57, %v1188_v55  ;;  %v1471_v59 = vpack.c.bf16 %v1191_v54, %v1190_v29  ;;  %v1045_v20 = vld [vmem:[%s1989_s9 + $0x60] sm:$0xff]  ;;  %v1047_v23 = vld [vmem:[%s1989_s9 + $0x70] sm:$0xff] }
 0x235   :  { %1313 = vmatmul.mubr.msk.f32.vlgmr.msra.gmra.mrb[0].mxu1 %vm469_vm10, %v706_v32  ;;  %v950_v33 = vsel %vm424_vm3, %v686_v24, %v658_v30  ;;  %v1474_v62 = vpack.c.bf16 %v1193_v61, %v1192_v60  ;;  %v1480_v7 = vpack.c.bf16 %v1034_v6, %v1033_v2  ;;  %v1483_v9 = vpack.c.bf16 %v1036_v8, %v1035_v5  ;;  %v1048_v24 = vld [vmem:[%s1989_s9 + $0x78] sm:$0xff] }
 0x236   :  { %1445 = vmatpush3.bf16.msra.mxu1 %v1444_v26  ;;  %1331 = vmatprep.mubr.msk.f32.mxu1 %vm1522_vm12, %v1517_v3  ;;  %v1486_v12 = vpack.c.bf16 %v1038_v11, %v1037_v10  ;;  %v1489_v4 = vpack.c.bf16 %v1040_v14, %v1039_v13  ;;  %v1492_v17 = vpack.c.bf16 %v1042_v16, %v1041_v15  ;;  %v18_v40 = vstv %s1991_s12 }
 0x237   :  { %1446 = vmatprep.subr.bf16.mxu1 %v1521_v1  ;;  %1481 = vmatpush3.bf16.msra.mxu0 %v1480_v7  ;;  %v1495_v19 = vpack.c.bf16 %v1044_v18, %v1043_v34  ;;  %v1501_v25 = vpack.c.bf16 %v1048_v24, %v1047_v23  ;;  %19 = vst [vmem:[#allocation4] sm:$0x1] %v18_v40 }
 0x238   :  { %1482 = vmatprep.subr.bf16.mxu0 %v1521_v1 }
 0x23a   :  { %1448 = vmatpush3.bf16.msra.mxu1 %v1447_v35 }
 0x23b   :  { %1449 = vmatprep.subr.bf16.mxu1 %v1521_v1  ;;  %1484 = vmatpush3.bf16.msra.mxu0 %v1483_v9 }
 0x23c   :  { %1485 = vmatprep.subr.bf16.mxu0 %v1521_v1 }
 0x23e   :  { %1451 = vmatpush3.bf16.msra.mxu1 %v1450_v38  ;;  %v1200_v48 = vld [vmem:[#allocation4] ss:$0 sm:$0xff] }
 0x23f   :  { %1452 = vmatprep.subr.bf16.mxu1 %v1521_v1  ;;  %1487 = vmatpush3.bf16.msra.mxu0 %v1486_v12 }
 0x240   :  { %1488 = vmatprep.subr.bf16.mxu0 %v1521_v1 }
 0x242   :  { %1454 = vmatpush3.bf16.msra.mxu1 %v1453_v41  ;;  %v1198_v41 = vld [vmem:[%s1992_s10] ss:$0 sm:$0xff] }
 0x243   :  { %1455 = vmatprep.subr.bf16.mxu1 %v1521_v1  ;;  %1490 = vmatpush3.bf16.msra.mxu0 %v1489_v4 }
 0x244   :  { %1491 = vmatprep.subr.bf16.mxu0 %v1521_v1 }
 0x245   :  { %1332 = vmatmul.mubr.msk.f32.vlgmr.msra.gmra.mrb[2].mxu1 %vm469_vm10, %v781_v21  ;;  %v1046_v21 = vld [vmem:[%s1989_s9 + $0x68] sm:$0xff] }
 0x246   :  { %1457 = vmatpush3.bf16.msra.mxu1 %v1456_v56  ;;  %1350 = vmatprep.mubr.msk.f32.mxu1 %vm1522_vm12, %v1517_v3  ;;  %v1498_v22 = vpack.c.bf16 %v1046_v21, %v1045_v20 }
 0x247   :  { %1458 = vmatprep.subr.bf16.mxu1 %v1521_v1  ;;  %1493 = vmatpush3.bf16.msra.mxu0 %v1492_v17 }
 0x248   :  { %1494 = vmatprep.subr.bf16.mxu0 %v1521_v1 }
 0x24a   :  { %1460 = vmatpush3.bf16.msra.mxu1 %v1459_v31 }
 0x24b   :  { %1461 = vmatprep.subr.bf16.mxu1 %v1521_v1  ;;  %1496 = vmatpush3.bf16.msra.mxu0 %v1495_v19 }
 0x24c   :  { %1497 = vmatprep.subr.bf16.mxu0 %v1521_v1 }
 0x24e   :  { %1463 = vmatpush3.bf16.msra.mxu1 %v1462_v49 }
 0x24f   :  { %1464 = vmatprep.subr.bf16.mxu1 %v1521_v1  ;;  %1499 = vmatpush3.bf16.msra.mxu0 %v1498_v22 }
 0x250   :  { %1500 = vmatprep.subr.bf16.mxu0 %v1521_v1 }
 0x252   :  { %1466 = vmatpush3.bf16.msra.mxu1 %v1465_v53 }
 0x253   :  { %1467 = vmatprep.subr.bf16.mxu1 %v1521_v1  ;;  %1502 = vmatpush3.bf16.msra.mxu0 %v1501_v25 }
 0x255   :  { %1351 = vmatmul.mubr.msk.f32.vlgmr.msra.gmra.mrb[4].mxu1 %vm469_vm10, %v865_v50 }
 0x256   :  { %1469 = vmatpush3.bf16.msra.mxu1 %v1468_v58  ;;  %1369 = vmatprep.mubr.msk.f32.mxu1 %vm1522_vm12, %v1517_v3  ;;  %v1195_v3 = vld [vmem:[%s1986_s7 + $0xf8] sm:$0xff] }
 0x257   :  { %1470 = vmatprep.subr.bf16.mxu1 %v1521_v1  ;;  %v1477_v0 = vpack.c.bf16 %v1195_v3, %v1194_v63 }
 0x25a   :  { %1472 = vmatpush3.bf16.msra.mxu1 %v1471_v59 }
 0x25b   :  { %1473 = vmatprep.subr.bf16.mxu1 %v1521_v1 }
 0x25e   :  { %1475 = vmatpush3.bf16.msra.mxu1 %v1474_v62 }
 0x25f   :  { %1476 = vmatprep.subr.bf16.mxu1 %v1521_v1  ;;  %v1197_v1 = vld [vmem:[%s1990_s8] ss:$0 sm:$0xff] }
 0x262   :  { %1478 = vmatpush3.bf16.msra.mxu1 %v1477_v0 }
 0x265   :  { %1370 = vmatmul.mubr.msk.f32.vlgmr.msra.gmra.mrb[6].mxu1 %vm469_vm10, %v950_v33 }
 0x308   :  { %v775_v26 = vpop.f32.mrb[0].mxu1 }
 0x309   :  { %v1314_v45 = vpop.f32.mrb[1].mxu1 }
 0x318   :  { %v850_v27 = vpop.f32.mrb[2].mxu1 }
 0x319   :  { %v851_v28 = vadd.f32 %v850_v27, %v775_v26  ;;  %v1333_v30 = vpop.f32.mrb[3].mxu1 }
 0x328   :  { %v934_v32 = vpop.f32.mrb[4].mxu1 }
 0x329   :  { %v938_v50 = vadd.f32 %v934_v32, %v851_v28  ;;  %v1352_v33 = vpop.f32.mrb[5].mxu1 }
 0x338   :  { %v1019_v35 = vpop.f32.mrb[6].mxu1 }
 0x339   :  { %v1023_v36 = vadd.f32 %v1019_v35, %v938_v50  ;;  %v1371_v37 = vpop.f32.mrb[7].mxu1 }
 0x33b   :  { %v1031_v38 = vadd.f32 %v1197_v1, %v1023_v36 }
 0x33d   :  { %v1032_v39 = vmax.f32 %v1031_v38, 0.0 }
 0x33f   :  { %1405 = vmatmul.mubr.f32.vlgmr.msra.gmra.mrb[2].mxu0 %v1032_v39 }
 0x412   :  { %v1122_v42 = vpop.f32.mrb[2].mxu0 }
 0x413   :  { %v1123_v43 = vadd.f32 %v1198_v41, %v1122_v42  ;;  %v1406_v56 = vpop.f32.mrb[3].mxu0 }
 0x415   :  { %v1126_v47 = vmax.f32 %v1123_v43, 0.0 }
 0x417   :  { %v1134_v31 = vmul.f32 %v1199_v46, %v1126_v47 }
 0x419   :  { %v1135_v44 = vsel %vm630_vm13, %v1134_v31, 0.0 }
 0x41a   :  { %1136 = vadd.xlane.f32.xlu0 %v1135_v44 }
 0x4a7   :  { %v1137_v49 = vpop.xlane.xlu0 %1136 }
 0x4a8   :  { %v1145_v51 = vadd.f32 %v1200_v48, %v1137_v49 }
 0x4aa   :  { %v1201_v52 = vmul.f32 -1.442695, %v1145_v51 }
 0x4ac   :  { %1512 = vpow2.f32 %v1201_v52 }
 0x4b6   :  { %v1513_v53 = vpop.eup %1512 }
 0x4b7   :  { %v1149_v55 = vadd.f32 1.0, %v1513_v53 }
 0x4b9   :  { %1514 = vrcp.f32 %v1149_v55 }
 0x4c3   :  { %v1515_v57 = vpop.eup %1514 }
 0x4c4   :  { %1153 = vst.msk [vmem:[%s1994_s13] sm:$0x3] %vm1152_vm14, %v1515_v57 }

</bundles_post_ra>
